<compile_context>
chip_gen: v5e
topology: v5e:2x2
jax: 0.10.0
libtpu: 0.0.40
codegen_flags: <defaults>
</compile_context>

<pallas_src>
import functools

import jax
import jax.numpy as jnp
from jax import lax
from jax.experimental import pallas as pl
from jax.experimental.pallas import tpu as pltpu


_TAPS3 = tuple((kh, kw) for kh in range(3) for kw in range(3))   # 3x3 tap order
_DILS = (1, 2, 4)          # aspp_module branch dilations (branch_1, r1=2, r2=4)


def _vmem_limit_bytes():
    """Per-generation scoped-VMEM budget (~50% of physical), with a safe fallback."""
    try:
        cap = int(pltpu.get_tpu_info().vmem_capacity_bytes)
    except Exception:
        cap = 128 * 1024 * 1024
    return int(min(cap // 2, 64 * 1024 * 1024))


# ----------------------------------------------------------------------------
# pltpu.roll direction probe (run once): pins down the rotation sign convention.
# ----------------------------------------------------------------------------
def _roll_probe_kernel(x_ref, o_ref):
    o_ref[...] = pltpu.roll(x_ref[...], 1, 1)


@functools.lru_cache(maxsize=None)
def _roll_matches_jnp():
    """True iff pltpu.roll(x, s, ax)[i] == x[(i - s) % n]  (jnp.roll convention)."""
    x = lax.broadcasted_iota(jnp.float32, (8, 128), 1)
    y = pl.pallas_call(
        _roll_probe_kernel,
        out_shape=jax.ShapeDtypeStruct((8, 128), jnp.float32),
    )(x)
    if bool(jnp.array_equal(y, jnp.roll(x, 1, axis=1))):
        return True
    if bool(jnp.array_equal(y, jnp.roll(x, -1, axis=1))):
        return False
    raise RuntimeError("Unexpected pltpu.roll semantics")


def _rolled(v, s, roll_jnp):
    """out[:, m] = v[:, (m + s) % M]  (caller masks out-of-range positions)."""
    if s == 0:
        return v
    m = v.shape[-1]
    shift = (-s) % m if roll_jnp else s % m
    return pltpu.roll(v, shift, v.ndim - 1)


# ----------------------------------------------------------------------------
# The single fused MSCF kernel (one grid step = one batch element)
# ----------------------------------------------------------------------------
def _mscf_fused_kernel(x_ref, mask_ref,
                       w1_ref, b1_ref, w2_ref, b2_ref, w0_ref, b0_ref,
                       wb_ref, bb_ref, w4_ref, b4_ref,
                       o_ref,
                       slab1_ref, slab2_ref, ybuf_ref,
                       *, W, cin, ai, dils, roll_jnp):
    # x_ref    : (1, Cin, M)   flat-spatial input (M = H*W in lanes)
    # mask_ref : (9 + 9*len(dils), M) f32 boundary masks (conv zero padding)
    # w*_ref   : packed weights (BN scale folded in); b*_ref: (Cout, 1) biases
    # o_ref    : (1, out_planes, M) lane-dense output
    # slab*_ref: VMEM im2col slabs; ybuf_ref: (3*ai, M) staging for branch inputs
    f32 = jnp.float32

    def shifted(v, dh, dw, mask_row):
        if dh == 0 and dw == 0:
            return v
        r = _rolled(v, dh * W + dw, roll_jnp)
        return r * mask_ref[mask_row:mask_row + 1, :]

    # ---- conv1: 3x3 (pad 1) -> im2col slab + ONE MXU dot; folded BN + ReLU ----
    x0 = x_ref[0]                                               # (Cin, M)
    for t, (kh, kw) in enumerate(_TAPS3):
        slab1_ref[t * cin:(t + 1) * cin, :] = shifted(x0, kh - 1, kw - 1, t)
    h = jnp.dot(w1_ref[...], slab1_ref[...], preferred_element_type=f32) + b1_ref[...]
    h = jnp.maximum(h, 0.0)                                     # (inter, M)

    # ---- conv2 (1x1) and fused b1_0/b2_0/b3_0 (one 1x1 -> 3*ai channels) ----
    h = jnp.maximum(
        jnp.dot(w2_ref[...], h, preferred_element_type=f32) + b2_ref[...], 0.0)
    y = jnp.maximum(
        jnp.dot(w0_ref[...], h, preferred_element_type=f32) + b0_ref[...], 0.0)
    ybuf_ref[...] = y                                           # (3*ai, M)

    # ---- three dilated 3x3 branch convs fused into ONE block-diagonal dot ----
    for j, d in enumerate(dils):
        yj = ybuf_ref[j * ai:(j + 1) * ai, :]
        for t, (kh, kw) in enumerate(_TAPS3):
            r0 = (j * 9 + t) * ai
            slab2_ref[r0:r0 + ai, :] = shifted(
                yj, (kh - 1) * d, (kw - 1) * d, 9 + j * 9 + t)
    xb = jnp.maximum(
        jnp.dot(wb_ref[...], slab2_ref[...], preferred_element_type=f32)
        + bb_ref[...], 0.0)                                     # (3*ai, M)

    # ---- branch_4: 1x1 over the (implicit) channel concat, no ReLU ----
    o_ref[0] = (jnp.dot(w4_ref[...], xb, preferred_element_type=f32)
                + b4_ref[...]).astype(o_ref.dtype)


# ----------------------------------------------------------------------------
# One-time parameter prepacking (outside the jitted forward)
# ----------------------------------------------------------------------------
def _fold_bn(bn):
    gamma, beta, rmean, rvar, eps = bn
    s = gamma / jnp.sqrt(rvar + eps)
    return s, beta - rmean * s


def _pack_kxk(w_oihw, bn):
    # (Cout, Cin, KH, KW) -> (Cout, KH*KW*Cin); column order = tap-major, channel-
    # minor (matches the im2col slab rows).  Eval-mode BN scale folded into weights.
    s, b = _fold_bn(bn)
    cout, cin, kh, kw = w_oihw.shape
    wp = jnp.transpose(w_oihw, (0, 2, 3, 1)).reshape(cout, kh * kw * cin)
    return (wp * s[:, None]).astype(jnp.float32), b.reshape(cout, 1).astype(jnp.float32)


def _pack_1x1(w_oihw, bn):
    s, b = _fold_bn(bn)
    wp = w_oihw[:, :, 0, 0] * s[:, None]
    return wp.astype(jnp.float32), b.reshape(-1, 1).astype(jnp.float32)


def mscf_prepack(params):
    """One-time repack of all MSCF parameters into fused, kernel-ready arrays."""
    w1, b1 = _pack_kxk(*params["conv1"])
    w2, b2 = _pack_1x1(*params["conv2"])

    # Fuse b1_0 / b2_0 / b3_0 (same input, 1x1) into one conv with Cout = 3*ai.
    p0 = [_pack_1x1(*params[k]) for k in ("b1_0", "b2_0", "b3_0")]
    w0 = jnp.concatenate([p[0] for p in p0], axis=0)
    b0 = jnp.concatenate([p[1] for p in p0], axis=0)

    # Fuse b1_1 / b2_1 / b3_1 (different dilations) into one block-diagonal weight
    # acting on the combined 3-branch im2col slab.
    pb = [_pack_kxk(*params[k]) for k in ("b1_1", "b2_1", "b3_1")]
    ai = pb[0][0].shape[0]
    kk = pb[0][0].shape[1]                       # 9*ai
    wb = jnp.zeros((3 * ai, 3 * kk), jnp.float32)
    for j, (wj, _) in enumerate(pb):
        wb = wb.at[j * ai:(j + 1) * ai, j * kk:(j + 1) * kk].set(wj)
    bb = jnp.concatenate([p[1] for p in pb], axis=0)

    w4, b4 = _pack_1x1(*params["b4"])            # branch_4 (no ReLU)
    return dict(w1=w1, b1=b1, w2=w2, b2=b2, w0=w0, b0=b0,
                wb=wb, bb=bb, w4=w4, b4=b4)


def _build_masks(H, W, dils, dtype):
    # Row layout: rows 0..8 -> conv1 taps (dil 1); rows 9 + j*9 + t -> branch j tap t.
    # Depends only on static shapes -> constant-folded by XLA.
    hh = jnp.arange(H, dtype=jnp.int32).reshape(H, 1)
    ww = jnp.arange(W, dtype=jnp.int32).reshape(1, W)

    def tap_mask(dh, dw):
        ok = ((hh + dh >= 0) & (hh + dh < H) & (ww + dw >= 0) & (ww + dw < W))
        return ok.astype(dtype).reshape(1, H * W)

    rows = [tap_mask(kh - 1, kw - 1) for (kh, kw) in _TAPS3]
    for d in dils:
        rows += [tap_mask((kh - 1) * d, (kw - 1) * d) for (kh, kw) in _TAPS3]
    return jnp.concatenate(rows, axis=0)


# ----------------------------------------------------------------------------
# Fused forward (single pallas_call)
# ----------------------------------------------------------------------------
@functools.partial(jax.jit, static_argnames=("roll_jnp",))
def _mscf_forward_impl(packed, x_nchw, *, roll_jnp):
    N, cin, H, W = x_nchw.shape
    M = H * W
    cout = packed["w4"].shape[0]
    ai = packed["w0"].shape[0] // 3

    x = x_nchw.reshape(N, cin, M)                    # free reshape, stays NCHW
    masks = _build_masks(H, W, _DILS, x.dtype)       # constant-folded

    kernel = functools.partial(
        _mscf_fused_kernel, W=W, cin=cin, ai=ai, dils=_DILS, roll_jnp=roll_jnp)

    order = ("w1", "b1", "w2", "b2", "w0", "b0", "wb", "bb", "w4", "b4")
    weights = [packed[k] for k in order]

    out = pl.pallas_call(
        kernel,
        out_shape=jax.ShapeDtypeStruct((N, cout, M), x.dtype),
        grid_spec=pltpu.PrefetchScalarGridSpec(
            num_scalar_prefetch=0,
            grid=(N,),
            in_specs=[pl.BlockSpec((1, cin, M), lambda n: (n, 0, 0)),
                      pl.BlockSpec(masks.shape, lambda n: (0, 0))]
                     + [pl.BlockSpec(a.shape, lambda n: (0, 0)) for a in weights],
            out_specs=pl.BlockSpec((1, cout, M), lambda n: (n, 0, 0)),
            scratch_shapes=[pltpu.VMEM((9 * cin, M), jnp.float32),
                            pltpu.VMEM((9 * len(_DILS) * ai, M), jnp.float32),
                            pltpu.VMEM((3 * ai, M), jnp.float32)],
        ),
        compiler_params=pltpu.CompilerParams(
            dimension_semantics=("parallel",),
            vmem_limit_bytes=_vmem_limit_bytes()),
    )(x, masks, *weights)

    return out.reshape(N, cout, H, W)


def mscf_forward(packed, x_nchw):
    return _mscf_forward_impl(packed, x_nchw, roll_jnp=_roll_matches_jnp())


# ----------------------------------------------------------------------------
# Deterministic parameter construction (mirrors the PyTorch module shapes)
# ----------------------------------------------------------------------------
def make_basicconv_params(key, cin, cout, k):
    kw_key, g_key, b_key = jax.random.split(key, 3)
    fan_in = cin * k * k
    w = jax.random.normal(kw_key, (cout, cin, k, k), jnp.float32) / jnp.sqrt(fan_in)
    gamma = 1.0 + 0.1 * jax.random.normal(g_key, (cout,), jnp.float32)
    beta = 0.1 * jax.random.normal(b_key, (cout,), jnp.float32)
    rmean = jnp.zeros((cout,), jnp.float32)
    rvar = jnp.ones((cout,), jnp.float32)
    return w, (gamma, beta, rmean, rvar, 1e-5)


def mscf_init(key, in_planes, out_planes):
    inter = out_planes // 4        # MSCF inter_planes
    ai = inter // 4                # aspp_module inter_planes
    keys = jax.random.split(key, 9)
    return {
        "conv1": make_basicconv_params(keys[0], in_planes, inter, 3),   # 3x3 pad 1
        "conv2": make_basicconv_params(keys[1], inter, inter, 1),       # 1x1
        "b1_0": make_basicconv_params(keys[2], inter, ai, 1),
        "b1_1": make_basicconv_params(keys[3], ai, ai, 3),              # 3x3 pad 1
        "b2_0": make_basicconv_params(keys[4], inter, ai, 1),
        "b2_1": make_basicconv_params(keys[5], ai, ai, 3),              # pad 2 dil 2
        "b3_0": make_basicconv_params(keys[6], inter, ai, 1),
        "b3_1": make_basicconv_params(keys[7], ai, ai, 3),              # pad 4 dil 4
        "b4":   make_basicconv_params(keys[8], 3 * ai, out_planes, 1),  # 1x1, no ReLU
    }


# ----------------------------------------------------------------------------
# Pure-JAX reference (for correctness checking only)
# ----------------------------------------------------------------------------
def _conv_ref(x_nhwc, w_oihw, bn, padding, dilation, relu):
    gamma, beta, rmean, rvar, eps = bn
    y = lax.conv_general_dilated(
        x_nhwc, jnp.transpose(w_oihw, (2, 3, 1, 0)),
        window_strides=(1, 1),
        padding=[(padding, padding), (padding, padding)],
        rhs_dilation=(dilation, dilation),
        dimension_numbers=("NHWC", "HWIO", "NHWC"))
    scale = gamma / jnp.sqrt(rvar + eps)
    y = y * scale + (beta - rmean * scale)
    return jnp.maximum(y, 0.0) if relu else y


def mscf_ref(params, x_nchw):
    x = jnp.transpose(x_nchw, (0, 2, 3, 1))
    w, bn = params["conv1"]; x = _conv_ref(x, w, bn, 1, 1, True)
    w, bn = params["conv2"]; x = _conv_ref(x, w, bn, 0, 1, True)
    w, bn = params["b1_0"]; x1 = _conv_ref(x, w, bn, 0, 1, True)
    w, bn = params["b1_1"]; x1 = _conv_ref(x1, w, bn, 1, 1, True)
    w, bn = params["b2_0"]; x2 = _conv_ref(x, w, bn, 0, 1, True)
    w, bn = params["b2_1"]; x2 = _conv_ref(x2, w, bn, 2, 2, True)
    w, bn = params["b3_0"]; x3 = _conv_ref(x, w, bn, 0, 1, True)
    w, bn = params["b3_1"]; x3 = _conv_ref(x3, w, bn, 4, 4, True)
    cat = jnp.concatenate([x1, x2, x3], axis=-1)
    w, bn = params["b4"]; out = _conv_ref(cat, w, bn, 0, 1, False)
    return jnp.transpose(out, (0, 3, 1, 2))


if __name__ == "__main__":
    key = jax.random.PRNGKey(0)
    k_param, k_x = jax.random.split(key)

    N, in_planes, out_planes, H, W = 2, 4, 32, 16, 16   # inter=8, aspp_inter=2
    x = jax.random.normal(k_x, (N, in_planes, H, W), jnp.float32)   # NCHW input

    params = mscf_init(k_param, in_planes, out_planes)
    packed = mscf_prepack(params)          # one-time repack, outside the jitted path

    out = jax.block_until_ready(mscf_forward(packed, x))
    assert out.shape == (N, out_planes, H, W), out.shape

    ref = jax.block_until_ready(mscf_ref(params, x))
    assert jnp.allclose(out, ref, atol=1e-3, rtol=1e-3), (
        float(jnp.max(jnp.abs(out - ref))))

    print("KERNEL_OK")
</pallas_src>

<mosaic_0001>
module attributes {stable_mosaic.version = 11 : i64} {
  func.func @_roll_probe_kernel(%arg0: memref<8x128xf32, #tpu.memory_space<vmem>>, %arg1: memref<8x128xf32, #tpu.memory_space<vmem>>) attributes {dimension_semantics = [], scalar_prefetch = 0 : i64, scratch_operands = 0 : i64, tpu.core_type = #tpu.core_type<tc>} {
    %c0 = arith.constant 0 : index
    %c0_0 = arith.constant 0 : index
    %0 = vector.load %arg0[%c0, %c0_0] : memref<8x128xf32, #tpu.memory_space<vmem>>, vector<8x128xf32>
    %c1_i32 = arith.constant 1 : i32
    %1 = tpu.dynamic_rotate %0 by %c1_i32 dim 1 : vector<8x128xf32>, i32 -> vector<8x128xf32>
    %c0_1 = arith.constant 0 : index
    %c0_2 = arith.constant 0 : index
    %2 = vector.load %arg1[%c0_1, %c0_2] : memref<8x128xf32, #tpu.memory_space<vmem>>, vector<8x128xf32>
    tpu.vector_store %arg1[%c0_1, %c0_2], %1 {strides = array<i32>} : memref<8x128xf32, #tpu.memory_space<vmem>>, vector<8x128xf32>,
    return
  }
}

</mosaic_0001>

<bundles_post_ra>
// kernel: tpu_custom_call.1
= control target key start
LH: loop header
LB: loop body
LE: loop exit
PB: predicated region body
PF: predicated region fallthrough
CT: control target
= control target key end

     0   :  { %6 = vsyncpa [#allocation3], 0  ;;  %s118_s0 = inlined_call_operand.hbm [shape: f32[8,128], index: 0, kind: input, shape index: {}]   ;;  %s119_s1 = inlined_call_operand.hbm [shape: f32[8,128], index: 1, kind: output, shape index: {}]  }
   0x1   :  { %7 = vsyncpa [#allocation4], 0  ;;  %s13_s8 = sshll.u32 %s118_s0, 4  ;;  %s99_s9 = smov [#allocation2]   ;;  %s14_s8 = int_to_ptr.hbm [resolvable:$true] %s13_s8 }
   0x2   :  { %s15_s10 = sshll.u32 %s99_s9, 4  ;;  %s16_s10 = int_to_ptr.vmem [resolvable:$true] %s15_s10 }
   0x3   :  { %18 = dma.hbm_to_vmem [thread:$0]  %s14_s8, 128, %s16_s10, [#allocation3]  }
   0x4   :  { %95 = dma.done.wait [#allocation3], 128  }
   0x5   :  { %96 = vsyncadd [#allocation3], 4294967168  ;;  %v23_v0 = vld [vmem:[#allocation2] sm:$0xff]  ;;  %s100_s11 = smov 1   ;;  %s101_s12 = smov [#allocation5]  }
   0x6   :  { %24 = vrot.lane.b32.xlu0 %v23_v0, %s100_s11  ;;  %s32_s13 = sshll.u32 %s101_s12, 4  ;;  %s34_s16 = sshll.u32 %s119_s1, 4  ;;  %s33_s13 = int_to_ptr.vmem [resolvable:$true] %s32_s13  ;;  %s35_s16 = int_to_ptr.hbm [resolvable:$true] %s34_s16 }
  0x78   :  { %v25_v1 = vpop.permute.xlu0 %24 }
  0x79   :  { %26 = vst [vmem:[#allocation5] sm:$0xff] %v25_v1 }
  0x7a   :  { %37 = dma.vmem_to_hbm [thread:$0]  %s33_s13, 128, %s35_s16, [#allocation4]  }
  0x7b   :  { %97 = dma.done.wait [#allocation4], 128  }
  0x7c   :  { %98 = vsyncadd [#allocation4], 4294967168 }
  0x7d   :  { %42 = vsyncpa [#allocation3], 1 }
  0x7e   :  { %43 = vsyncpa [#allocation4], 1 }

</bundles_post_ra>
